<compile_context>
chip_gen: v7x
topology: tpu7x:2x2x1
jax: 0.10.0
libtpu: 0.0.40
codegen_flags: <defaults>
</compile_context>

<pallas_src>
import functools

import jax
import jax.numpy as jnp
from jax.experimental import pallas as pl
from jax.experimental.pallas import tpu as pltpu

LANES = 128
SUBLANES = 8


def _round_up(x, m):
    return (x + m - 1) // m * m


# ---------------------------------------------------------------------------
# Fused kernel: stem conv (im2col matmul) + BN + SiLU + GAP + head + fc
# ---------------------------------------------------------------------------
def fused_stem_pool_head_kernel(
    x_ref,        # (1, TM, K_pad)        bf16  im2col rows for (batch b, tile m)
    w_ref,        # (K_pad, C_pad)        bf16  stem conv weight (im2col layout)
    scale_ref,    # (8, C_pad)            f32   folded BN scale (rows identical)
    shift_ref,    # (8, C_pad)            f32   folded BN shift
    head_w_ref,   # (C_pad, N_pad)        f32   backbone classifier weight
    head_b_ref,   # (8, N_pad)            f32
    fc_wi_ref,    # (N_pad, N_pad)        f32   fc rows multiplying backbone logits
    fc_wn_ref,    # (F_pad, N_pad)        f32   fc rows multiplying x_num
    fc_b_ref,     # (8, N_pad)            f32
    xnum_ref,     # (1, 8, F_pad)         f32   x_num row of batch b (8 copies)
    o_ref,        # (1, 8, N_pad)         f32   output row of batch b (8 copies)
    acc_ref,      # (8, C_pad)            f32   pooled-sum accumulator (scratch)
    *, tm, n_pos, p_pad, inv_n_pos):
    m = pl.program_id(1)

    @pl.when(m == 0)
    def _():
        acc_ref[...] = jnp.zeros_like(acc_ref)

    # Stem Conv3d as im2col matmul on the MXU (bf16 in, f32 accumulate).
    y = jnp.dot(x_ref[0], w_ref[...], preferred_element_type=jnp.float32)
    # Folded BatchNorm3d (eval) + SiLU, in f32 on the VPU/EUP.
    y = y * scale_ref[0:1, :] + shift_ref[0:1, :]
    act = y * jax.nn.sigmoid(y)

    # Mask grid-padding rows so they do not pollute the global average pool.
    if p_pad > n_pos:
        row = m * tm + jax.lax.broadcasted_iota(jnp.int32, (tm, 1), 0)
        act = jnp.where(row < n_pos, act, 0.0)

    # Accumulate global-average-pool partial sums (broadcast to 8 sublanes).
    acc_ref[...] = acc_ref[...] + jnp.sum(act, axis=0, keepdims=True)

    # Epilogue on the last M-tile of this batch: GAP -> head Linear ->
    # concat-with-x_num (as a split matmul) -> fc Linear.
    @pl.when(m == pl.num_programs(1) - 1)
    def _():
        pooled = acc_ref[...] * inv_n_pos                       # (8, C_pad)
        logits = jnp.dot(pooled, head_w_ref[...],
                         preferred_element_type=jnp.float32) + head_b_ref[...]
        x_num = xnum_ref[0]                                     # (8, F_pad)
        out = (jnp.dot(logits, fc_wi_ref[...],
                       preferred_element_type=jnp.float32)
               + jnp.dot(x_num, fc_wn_ref[...],
                         preferred_element_type=jnp.float32)
               + fc_b_ref[...])
        o_ref[0] = out


def _fused_forward_call(x_col, w, scale, shift, head_w, head_b,
                        fc_wi, fc_wn, fc_b, x_num_b, *, tm, n_pos):
    bsz, p_pad, k_pad = x_col.shape
    c_pad = w.shape[1]
    n_pad = head_w.shape[1]
    f_pad = fc_wn.shape[0]
    num_m = p_pad // tm

    kernel = functools.partial(
        fused_stem_pool_head_kernel,
        tm=tm, n_pos=n_pos, p_pad=p_pad, inv_n_pos=float(1.0 / n_pos))

    cost = pl.CostEstimate(
        flops=int(2 * bsz * p_pad * k_pad * c_pad),
        transcendentals=int(bsz * p_pad * c_pad),
        bytes_accessed=int(x_col.size * 2 + w.size * 2
                           + (scale.size + shift.size + head_w.size
                              + head_b.size + fc_wi.size + fc_wn.size
                              + fc_b.size + x_num_b.size) * 4
                           + bsz * SUBLANES * n_pad * 4))

    return pl.pallas_call(
        kernel,
        out_shape=jax.ShapeDtypeStruct((bsz, SUBLANES, n_pad), jnp.float32),
        grid=(bsz, num_m),
        in_specs=[
            pl.BlockSpec((1, tm, k_pad), lambda b, m: (b, m, 0)),
            pl.BlockSpec((k_pad, c_pad), lambda b, m: (0, 0)),
            pl.BlockSpec((SUBLANES, c_pad), lambda b, m: (0, 0)),
            pl.BlockSpec((SUBLANES, c_pad), lambda b, m: (0, 0)),
            pl.BlockSpec((c_pad, n_pad), lambda b, m: (0, 0)),
            pl.BlockSpec((SUBLANES, n_pad), lambda b, m: (0, 0)),
            pl.BlockSpec((n_pad, n_pad), lambda b, m: (0, 0)),
            pl.BlockSpec((f_pad, n_pad), lambda b, m: (0, 0)),
            pl.BlockSpec((SUBLANES, n_pad), lambda b, m: (0, 0)),
            pl.BlockSpec((1, SUBLANES, f_pad), lambda b, m: (b, 0, 0)),
        ],
        out_specs=pl.BlockSpec((1, SUBLANES, n_pad), lambda b, m: (b, 0, 0)),
        scratch_shapes=[pltpu.VMEM((SUBLANES, c_pad), jnp.float32)],
        compiler_params=pltpu.CompilerParams(
            dimension_semantics=("parallel", "arbitrary"),
            vmem_limit_bytes=32 * 1024 * 1024),
        cost_estimate=cost,
    )(x_col, w, scale, shift, head_w, head_b, fc_wi, fc_wn, fc_b, x_num_b)


# ---------------------------------------------------------------------------
# Wrapper glue (layout transpose, pad, im2col, param folding/padding)
# ---------------------------------------------------------------------------
def _stem_im2col(x_img):
    """NCDHW -> im2col rows for Conv3d(k=3, s=2, p=1)."""
    b, cin, d, h, w = x_img.shape
    do = (d - 1) // 2 + 1
    ho = (h - 1) // 2 + 1
    wo = (w - 1) // 2 + 1
    x = jnp.transpose(x_img, (0, 2, 3, 4, 1)).astype(jnp.float32)
    xp = jnp.pad(x, ((0, 0), (1, 1), (1, 1), (1, 1), (0, 0)))
    taps = []
    for kd in range(3):
        for kh in range(3):
            for kw in range(3):
                taps.append(xp[:, kd:kd + 2 * do:2, kh:kh + 2 * ho:2,
                               kw:kw + 2 * wo:2, :])
    x_col = jnp.concatenate(taps, axis=-1)
    return x_col.reshape(b, do * ho * wo, 27 * cin), (do, ho, wo)


@functools.partial(jax.jit, static_argnames=("tm",))
def efficientnet_multimodal_forward(x_img, x_num, params, *, tm=2048):
    """x_img: (B, Cin, D, H, W) float32 (NCDHW); x_num: (B, F). -> (B, n_classes)."""
    bsz, cin = x_img.shape[0], x_img.shape[1]
    stem_c = params["stem_w"].shape[0]
    n_classes = params["head_b"].shape[0]
    f_num = x_num.shape[1]

    # TODO(synk): move this gather in-kernel (manual DMA) to avoid the im2col
    # materialization / read amplification.
    x_col, (do, ho, wo) = _stem_im2col(x_img)
    p = do * ho * wo

    k = 27 * cin
    k_pad = _round_up(k, 32)
    c_pad = _round_up(stem_c, LANES)
    n_pad = _round_up(n_classes, LANES)
    f_pad = _round_up(f_num, LANES)

    tm_eff = min(tm, _round_up(p, SUBLANES))
    p_pad = _round_up(p, tm_eff)

    # bf16 MXU feed; zero padding only (exact).
    x_col = jnp.pad(x_col, ((0, 0), (0, p_pad - p), (0, k_pad - k)))
    x_col = x_col.astype(jnp.bfloat16)

    # Stem weight (Cout, Cin, 3,3,3) -> (kd,kh,kw,cin) x cout im2col matrix.
    w_mat = jnp.transpose(params["stem_w"], (2, 3, 4, 1, 0)).reshape(k, stem_c)
    w_mat = jnp.pad(w_mat, ((0, k_pad - k), (0, c_pad - stem_c)))
    w_mat = w_mat.astype(jnp.bfloat16)

    # BatchNorm3d (eval) folded to per-channel scale/shift, kept in f32.
    eps = 1e-5
    scale = params["bn_gamma"] / jnp.sqrt(params["bn_var"] + eps)
    shift = params["bn_beta"] - params["bn_mean"] * scale
    scale_p = jnp.tile(jnp.pad(scale, (0, c_pad - stem_c))[None, :],
                       (SUBLANES, 1)).astype(jnp.float32)
    shift_p = jnp.tile(jnp.pad(shift, (0, c_pad - stem_c))[None, :],
                       (SUBLANES, 1)).astype(jnp.float32)

    # Backbone classifier Linear (stored (in, out) and lane-padded).
    head_w = jnp.pad(params["head_w"].T,
                     ((0, c_pad - stem_c), (0, n_pad - n_classes))).astype(jnp.float32)
    head_b = jnp.tile(jnp.pad(params["head_b"], (0, n_pad - n_classes))[None, :],
                      (SUBLANES, 1)).astype(jnp.float32)

    # fc on cat((logits, x_num)) as an exact split matmul.
    fc_w = params["fc_w"]                               # (NC, NC + F)
    fc_wi = jnp.pad(fc_w[:, :n_classes].T,
                    ((0, n_pad - n_classes), (0, n_pad - n_classes))).astype(jnp.float32)
    fc_wn = jnp.pad(fc_w[:, n_classes:].T,
                    ((0, f_pad - f_num), (0, n_pad - n_classes))).astype(jnp.float32)
    fc_b = jnp.tile(jnp.pad(params["fc_b"], (0, n_pad - n_classes))[None, :],
                    (SUBLANES, 1)).astype(jnp.float32)

    # Per-batch x_num row, broadcast to 8 sublanes and lane-padded.
    x_num_p = jnp.pad(x_num.astype(jnp.float32), ((0, 0), (0, f_pad - f_num)))
    x_num_b = jnp.tile(x_num_p[:, None, :], (1, SUBLANES, 1))

    out = _fused_forward_call(x_col, w_mat, scale_p, shift_p, head_w, head_b,
                              fc_wi, fc_wn, fc_b, x_num_b,
                              tm=tm_eff, n_pos=p)
    return out[:bsz, 0, :n_classes]


# ---------------------------------------------------------------------------
# Reference (plain JAX) and deterministic parameter construction
# ---------------------------------------------------------------------------
def reference_forward(x_img, x_num, params):
    cin = x_img.shape[1]
    stem_c = params["stem_w"].shape[0]
    x_col, _ = _stem_im2col(x_img)
    k = 27 * cin
    eps = 1e-5
    scale = params["bn_gamma"] / jnp.sqrt(params["bn_var"] + eps)
    shift = params["bn_beta"] - params["bn_mean"] * scale
    w_mat = jnp.transpose(params["stem_w"], (2, 3, 4, 1, 0)).reshape(k, stem_c)
    xc = x_col.astype(jnp.bfloat16).astype(jnp.float32)   # match kernel MXU feed
    wm = w_mat.astype(jnp.bfloat16).astype(jnp.float32)
    y = jnp.einsum("bpk,kc->bpc", xc, wm) * scale + shift
    act = y * jax.nn.sigmoid(y)
    pooled = jnp.mean(act, axis=1)
    logits = pooled @ params["head_w"].T + params["head_b"]
    cat = jnp.concatenate([logits, x_num.astype(jnp.float32)], axis=1)
    return cat @ params["fc_w"].T + params["fc_b"]


def make_params(key, cin=1, stem_c=32, n_classes=2, in_num_features=25):
    keys = jax.random.split(key, 8)
    stem_w = 0.1 * jax.random.normal(keys[0], (stem_c, cin, 3, 3, 3), jnp.float32)
    bn_gamma = 1.0 + 0.1 * jax.random.normal(keys[1], (stem_c,), jnp.float32)
    bn_beta = 0.1 * jax.random.normal(keys[2], (stem_c,), jnp.float32)
    bn_mean = 0.1 * jax.random.normal(keys[3], (stem_c,), jnp.float32)
    bn_var = 1.0 + 0.1 * jnp.abs(jax.random.normal(keys[4], (stem_c,), jnp.float32))
    head_w = 0.1 * jax.random.normal(keys[5], (n_classes, stem_c), jnp.float32)
    head_b = 0.01 * jax.random.normal(keys[6], (n_classes,), jnp.float32)
    fc_w = 0.1 * jax.random.normal(
        keys[7], (n_classes, n_classes + in_num_features), jnp.float32)
    fc_b = jnp.zeros((n_classes,), jnp.float32)
    return dict(stem_w=stem_w, bn_gamma=bn_gamma, bn_beta=bn_beta,
                bn_mean=bn_mean, bn_var=bn_var,
                head_w=head_w, head_b=head_b, fc_w=fc_w, fc_b=fc_b)


# ---------------------------------------------------------------------------
if __name__ == "__main__":
    key = jax.random.PRNGKey(0)
    k_img, k_num, k_par = jax.random.split(key, 3)

    B, Cin, D, H, W = 2, 1, 16, 16, 16
    in_num_features, n_classes = 25, 2

    x_img = jax.random.normal(k_img, (B, Cin, D, H, W), jnp.float32)
    x_num = jax.random.normal(k_num, (B, in_num_features), jnp.float32)
    params = make_params(k_par, cin=Cin, stem_c=32, n_classes=n_classes,
                         in_num_features=in_num_features)

    # tm=128 -> grid (B, 4): exercises the tiled M axis and the fused
    # accumulate-then-finalize epilogue.
    out = efficientnet_multimodal_forward(x_img, x_num, params, tm=128)
    out = jax.block_until_ready(out)
    assert out.shape == (B, n_classes), out.shape

    ref = reference_forward(x_img, x_num, params)
    assert jnp.allclose(out, ref, atol=2e-2, rtol=2e-2), (out, ref)
    print("KERNEL_OK")
</pallas_src>

<mosaic_0001>
module attributes {stable_mosaic.version = 11 : i64} {
  func.func @fused_stem_pool_head_kernel(%arg0: i32, %arg1: i32, %arg2: memref<1x128x32xbf16, #tpu.memory_space<vmem>>, %arg3: memref<32x128xbf16, #tpu.memory_space<vmem>>, %arg4: memref<8x128xf32, #tpu.memory_space<vmem>>, %arg5: memref<8x128xf32, #tpu.memory_space<vmem>>, %arg6: memref<128x128xf32, #tpu.memory_space<vmem>>, %arg7: memref<8x128xf32, #tpu.memory_space<vmem>>, %arg8: memref<128x128xf32, #tpu.memory_space<vmem>>, %arg9: memref<128x128xf32, #tpu.memory_space<vmem>>, %arg10: memref<8x128xf32, #tpu.memory_space<vmem>>, %arg11: memref<1x8x128xf32, #tpu.memory_space<vmem>>, %arg12: memref<1x8x128xf32, #tpu.memory_space<vmem>>, %arg13: memref<8x128xf32, #tpu.memory_space<vmem>>) attributes {dimension_semantics = [#tpu.dimension_semantics<parallel>, #tpu.dimension_semantics<arbitrary>], iteration_bounds = array<i64: 2, 4>, scalar_prefetch = 0 : i64, scratch_operands = 1 : i64, tpu.core_type = #tpu.core_type<tc>, window_params = [{transform_indices = @transform_0, window_bounds = array<i64: 1, 128, 32>}, {pipeline_mode = #tpu.pipeline_mode<synchronous>, transform_indices = @transform_1, window_bounds = array<i64: 32, 128>}, {pipeline_mode = #tpu.pipeline_mode<synchronous>, transform_indices = @transform_2, window_bounds = array<i64: 8, 128>}, {pipeline_mode = #tpu.pipeline_mode<synchronous>, transform_indices = @transform_3, window_bounds = array<i64: 8, 128>}, {pipeline_mode = #tpu.pipeline_mode<synchronous>, transform_indices = @transform_4, window_bounds = array<i64: 128, 128>}, {pipeline_mode = #tpu.pipeline_mode<synchronous>, transform_indices = @transform_5, window_bounds = array<i64: 8, 128>}, {pipeline_mode = #tpu.pipeline_mode<synchronous>, transform_indices = @transform_6, window_bounds = array<i64: 128, 128>}, {pipeline_mode = #tpu.pipeline_mode<synchronous>, transform_indices = @transform_7, window_bounds = array<i64: 128, 128>}, {pipeline_mode = #tpu.pipeline_mode<synchronous>, transform_indices = @transform_8, window_bounds = array<i64: 8, 128>}, {transform_indices = @transform_9, window_bounds = array<i64: 1, 8, 128>}, {transform_indices = @transform_10, window_bounds = array<i64: 1, 8, 128>}]} {
    %c0_i32 = arith.constant 0 : i32
    %0 = arith.cmpi eq, %arg1, %c0_i32 : i32
    %1 = arith.extui %0 : i1 to i32
    %c0_i32_0 = arith.constant 0 : i32
    %2 = arith.cmpi ne, %1, %c0_i32_0 : i32
    scf.if %2 {
      %cst_16 = arith.constant 0.000000e+00 : f32
      %28 = vector.broadcast %cst_16 : f32 to vector<8x128xf32>
      %c0_17 = arith.constant 0 : index
      %c0_18 = arith.constant 0 : index
      %29 = vector.load %arg13[%c0_17, %c0_18] : memref<8x128xf32, #tpu.memory_space<vmem>>, vector<8x128xf32>
      tpu.vector_store %arg13[%c0_17, %c0_18], %28 {strides = array<i32>} : memref<8x128xf32, #tpu.memory_space<vmem>>, vector<8x128xf32>,
    } else {
    }
    %c0 = arith.constant 0 : index
    %c0_1 = arith.constant 0 : index
    %c0_2 = arith.constant 0 : index
    %3 = vector.load %arg2[%c0, %c0_1, %c0_2] : memref<1x128x32xbf16, #tpu.memory_space<vmem>>, vector<1x128x32xbf16>
    %4 = vector.shape_cast %3 : vector<1x128x32xbf16> to vector<128x32xbf16>
    %c0_3 = arith.constant 0 : index
    %c0_4 = arith.constant 0 : index
    %5 = vector.load %arg3[%c0_3, %c0_4] : memref<32x128xbf16, #tpu.memory_space<vmem>>, vector<32x128xbf16>
    %cst = arith.constant dense<0.000000e+00> : vector<128x128xf32>
    %6 = tpu.matmul %4, %5, %cst {dimension_numbers = #tpu.dot_dimension_numbers<[1], [0], [0], [1], [0, 0, 1, 1], [], []>} : vector<128x32xbf16>, vector<32x128xbf16>, vector<128x128xf32> -> vector<128x128xf32>
    %c0_5 = arith.constant 0 : index
    %c0_6 = arith.constant 0 : index
    %7 = vector.load %arg4[%c0_5, %c0_6] : memref<8x128xf32, #tpu.memory_space<vmem>>, vector<1x128xf32>
    %8 = vector.broadcast %7 : vector<1x128xf32> to vector<128x128xf32>
    %9 = arith.mulf %6, %8 : vector<128x128xf32>
    %c0_7 = arith.constant 0 : index
    %c0_8 = arith.constant 0 : index
    %10 = vector.load %arg5[%c0_7, %c0_8] : memref<8x128xf32, #tpu.memory_space<vmem>>, vector<1x128xf32>
    %11 = vector.broadcast %10 : vector<1x128xf32> to vector<128x128xf32>
    %12 = arith.addf %9, %11 : vector<128x128xf32>
    %13 = arith.negf %12 : vector<128x128xf32>
    %14 = math.exp %13 : vector<128x128xf32>
    %cst_9 = arith.constant 1.000000e+00 : f32
    %15 = vector.broadcast %cst_9 : f32 to vector<128x128xf32>
    %16 = arith.addf %15, %14 : vector<128x128xf32>
    %17 = arith.divf %15, %16 : vector<128x128xf32>
    %18 = arith.mulf %12, %17 : vector<128x128xf32>
    %c0_10 = arith.constant 0 : index
    %c0_11 = arith.constant 0 : index
    %19 = vector.load %arg13[%c0_10, %c0_11] : memref<8x128xf32, #tpu.memory_space<vmem>>, vector<8x128xf32>
    %cst_12 = arith.constant dense<0.000000e+00> : vector<128xf32>
    %20 = vector.multi_reduction <add>, %18, %cst_12 [0] : vector<128x128xf32> to vector<128xf32>
    %21 = vector.shape_cast %20 : vector<128xf32> to vector<1x128xf32>
    %22 = vector.broadcast %21 : vector<1x128xf32> to vector<8x128xf32>
    %23 = arith.addf %19, %22 : vector<8x128xf32>
    %c0_13 = arith.constant 0 : index
    %c0_14 = arith.constant 0 : index
    %24 = vector.load %arg13[%c0_13, %c0_14] : memref<8x128xf32, #tpu.memory_space<vmem>>, vector<8x128xf32>
    tpu.vector_store %arg13[%c0_13, %c0_14], %23 {strides = array<i32>} : memref<8x128xf32, #tpu.memory_space<vmem>>, vector<8x128xf32>,
    %c3_i32 = arith.constant 3 : i32
    %25 = arith.cmpi eq, %arg1, %c3_i32 : i32
    %26 = arith.extui %25 : i1 to i32
    %c0_i32_15 = arith.constant 0 : i32
    %27 = arith.cmpi ne, %26, %c0_i32_15 : i32
    scf.if %27 {
      %c0_16 = arith.constant 0 : index
      %c0_17 = arith.constant 0 : index
      %28 = vector.load %arg13[%c0_16, %c0_17] : memref<8x128xf32, #tpu.memory_space<vmem>>, vector<8x128xf32>
      %cst_18 = arith.constant 0.001953125 : f32
      %29 = vector.broadcast %cst_18 : f32 to vector<8x128xf32>
      %30 = arith.mulf %28, %29 : vector<8x128xf32>
      %c0_19 = arith.constant 0 : index
      %c0_20 = arith.constant 0 : index
      %31 = vector.load %arg6[%c0_19, %c0_20] : memref<128x128xf32, #tpu.memory_space<vmem>>, vector<128x128xf32>
      %cst_21 = arith.constant dense<0.000000e+00> : vector<8x128xf32>
      %32 = tpu.matmul %30, %31, %cst_21 {dimension_numbers = #tpu.dot_dimension_numbers<[1], [0], [0], [1], [0, 0, 1, 1], [], []>} : vector<8x128xf32>, vector<128x128xf32>, vector<8x128xf32> -> vector<8x128xf32>
      %c0_22 = arith.constant 0 : index
      %c0_23 = arith.constant 0 : index
      %33 = vector.load %arg7[%c0_22, %c0_23] : memref<8x128xf32, #tpu.memory_space<vmem>>, vector<8x128xf32>
      %34 = arith.addf %32, %33 : vector<8x128xf32>
      %c0_24 = arith.constant 0 : index
      %c0_25 = arith.constant 0 : index
      %c0_26 = arith.constant 0 : index
      %35 = vector.load %arg11[%c0_24, %c0_25, %c0_26] : memref<1x8x128xf32, #tpu.memory_space<vmem>>, vector<1x8x128xf32>
      %36 = vector.shape_cast %35 : vector<1x8x128xf32> to vector<8x128xf32>
      %c0_27 = arith.constant 0 : index
      %c0_28 = arith.constant 0 : index
      %37 = vector.load %arg8[%c0_27, %c0_28] : memref<128x128xf32, #tpu.memory_space<vmem>>, vector<128x128xf32>
      %cst_29 = arith.constant dense<0.000000e+00> : vector<8x128xf32>
      %38 = tpu.matmul %34, %37, %cst_29 {dimension_numbers = #tpu.dot_dimension_numbers<[1], [0], [0], [1], [0, 0, 1, 1], [], []>} : vector<8x128xf32>, vector<128x128xf32>, vector<8x128xf32> -> vector<8x128xf32>
      %c0_30 = arith.constant 0 : index
      %c0_31 = arith.constant 0 : index
      %39 = vector.load %arg9[%c0_30, %c0_31] : memref<128x128xf32, #tpu.memory_space<vmem>>, vector<128x128xf32>
      %cst_32 = arith.constant dense<0.000000e+00> : vector<8x128xf32>
      %40 = tpu.matmul %36, %39, %cst_32 {dimension_numbers = #tpu.dot_dimension_numbers<[1], [0], [0], [1], [0, 0, 1, 1], [], []>} : vector<8x128xf32>, vector<128x128xf32>, vector<8x128xf32> -> vector<8x128xf32>
      %41 = arith.addf %38, %40 : vector<8x128xf32>
      %c0_33 = arith.constant 0 : index
      %c0_34 = arith.constant 0 : index
      %42 = vector.load %arg10[%c0_33, %c0_34] : memref<8x128xf32, #tpu.memory_space<vmem>>, vector<8x128xf32>
      %43 = arith.addf %41, %42 : vector<8x128xf32>
      %c0_35 = arith.constant 0 : index
      %c0_36 = arith.constant 0 : index
      %c0_37 = arith.constant 0 : index
      %44 = vector.load %arg12[%c0_35, %c0_36, %c0_37] : memref<1x8x128xf32, #tpu.memory_space<vmem>>, vector<1x8x128xf32>
      %45 = vector.shape_cast %44 : vector<1x8x128xf32> to vector<8x128xf32>
      %46 = vector.shape_cast %43 : vector<8x128xf32> to vector<1x8x128xf32>
      tpu.vector_store %arg12[%c0_35, %c0_36, %c0_37], %46 {strides = array<i32>} : memref<1x8x128xf32, #tpu.memory_space<vmem>>, vector<1x8x128xf32>,
    } else {
    }
    return
  }
  func.func @transform_0(%arg0: i32, %arg1: i32) -> (i32, i32, i32) {
    %c0_i32 = arith.constant 0 : i32
    %c0_i32_0 = arith.constant 0 : i32
    return %arg0, %arg1, %c0_i32 : i32, i32, i32
  }
  func.func @transform_1(%arg0: i32, %arg1: i32) -> (i32, i32) {
    %c0_i32 = arith.constant 0 : i32
    %c0_i32_0 = arith.constant 0 : i32
    %c0_i32_1 = arith.constant 0 : i32
    return %c0_i32, %c0_i32_0 : i32, i32
  }
  func.func @transform_2(%arg0: i32, %arg1: i32) -> (i32, i32) {
    %c0_i32 = arith.constant 0 : i32
    %c0_i32_0 = arith.constant 0 : i32
    %c0_i32_1 = arith.constant 0 : i32
    return %c0_i32, %c0_i32_0 : i32, i32
  }
  func.func @transform_3(%arg0: i32, %arg1: i32) -> (i32, i32) {
    %c0_i32 = arith.constant 0 : i32
    %c0_i32_0 = arith.constant 0 : i32
    %c0_i32_1 = arith.constant 0 : i32
    return %c0_i32, %c0_i32_0 : i32, i32
  }
  func.func @transform_4(%arg0: i32, %arg1: i32) -> (i32, i32) {
    %c0_i32 = arith.constant 0 : i32
    %c0_i32_0 = arith.constant 0 : i32
    %c0_i32_1 = arith.constant 0 : i32
    return %c0_i32, %c0_i32_0 : i32, i32
  }
  func.func @transform_5(%arg0: i32, %arg1: i32) -> (i32, i32) {
    %c0_i32 = arith.constant 0 : i32
    %c0_i32_0 = arith.constant 0 : i32
    %c0_i32_1 = arith.constant 0 : i32
    return %c0_i32, %c0_i32_0 : i32, i32
  }
  func.func @transform_6(%arg0: i32, %arg1: i32) -> (i32, i32) {
    %c0_i32 = arith.constant 0 : i32
    %c0_i32_0 = arith.constant 0 : i32
    %c0_i32_1 = arith.constant 0 : i32
    return %c0_i32, %c0_i32_0 : i32, i32
  }
  func.func @transform_7(%arg0: i32, %arg1: i32) -> (i32, i32) {
    %c0_i32 = arith.constant 0 : i32
    %c0_i32_0 = arith.constant 0 : i32
    %c0_i32_1 = arith.constant 0 : i32
    return %c0_i32, %c0_i32_0 : i32, i32
  }
  func.func @transform_8(%arg0: i32, %arg1: i32) -> (i32, i32) {
    %c0_i32 = arith.constant 0 : i32
    %c0_i32_0 = arith.constant 0 : i32
    %c0_i32_1 = arith.constant 0 : i32
    return %c0_i32, %c0_i32_0 : i32, i32
  }
  func.func @transform_9(%arg0: i32, %arg1: i32) -> (i32, i32, i32) {
    %c0_i32 = arith.constant 0 : i32
    %c0_i32_0 = arith.constant 0 : i32
    %c0_i32_1 = arith.constant 0 : i32
    return %arg0, %c0_i32, %c0_i32_0 : i32, i32, i32
  }
  func.func @transform_10(%arg0: i32, %arg1: i32) -> (i32, i32, i32) {
    %c0_i32 = arith.constant 0 : i32
    %c0_i32_0 = arith.constant 0 : i32
    %c0_i32_1 = arith.constant 0 : i32
    return %arg0, %c0_i32, %c0_i32_0 : i32, i32, i32
  }
}

</mosaic_0001>

<bundles_post_ra>
// kernel: efficientnet_multimodal_forward.1
= control target key start
LH: loop header
LB: loop body
LE: loop exit
PB: predicated region body
PF: predicated region fallthrough
CT: control target
= control target key end

     0   :  { %s1661_s13 = smov 0   ;;  %s1663_s14 = smov 0   ;;  %s2026_s0 = inlined_call_operand.vmem [shape: bf16[2,512,32], index: 0, kind: input, shape index: {}]   ;;  %s2027_s1 = inlined_call_operand.vmem [shape: bf16[32,128], index: 1, kind: input, shape index: {}]   ;;  %s2028_s2 = inlined_call_operand.vmem [shape: f32[8,128], index: 2, kind: input, shape index: {}]   ;;  %s2029_s3 = inlined_call_operand.vmem [shape: f32[8,128], index: 3, kind: input, shape index: {}]   ;;  %s2030_s4 = inlined_call_operand.vmem [shape: f32[128,128], index: 4, kind: input, shape index: {}]   ;;  %s2031_s5 = inlined_call_operand.vmem [shape: f32[8,128], index: 5, kind: input, shape index: {}]   ;;  %s2032_s6 = inlined_call_operand.vmem [shape: f32[128,128], index: 6, kind: input, shape index: {}]   ;;  %s2033_s7 = inlined_call_operand.vmem [shape: f32[128,128], index: 7, kind: input, shape index: {}]   ;;  %s2034_s8 = inlined_call_operand.vmem [shape: f32[8,128], index: 8, kind: input, shape index: {}]   ;;  %s2035_s9 = inlined_call_operand.vmem [shape: f32[2,8,128], index: 9, kind: input, shape index: {}]   ;;  %s2036_s10 = inlined_call_operand.vmem [shape: f32[2,8,128], index: 10, kind: output, shape index: {}]  }
   0x1   :  { %s1665_s15 = smov 0   ;;  %s1667_s16 = smov 0  }
   0x2   :  { %s1669_s17 = smov 0  }
   0x3 LB: > { %s29_s18 = sadd.s32 1, %s1592_s15  ;;  %s32_s19 = sadd.s32 1, %s1596_s16  ;;  %s1600_s17 = sphi %s1669_s17, %s20_s17   ;;  %s1596_s16 = sphi %s1667_s16, %s2042_s16   ;;  %s1592_s15 = sphi %s1665_s15, %s2041_s15   ;;  %s1588_s14 = sphi %s1663_s14, %s2040_s14   ;;  %s1584_s13 = sphi %s1661_s13, %s2039_s13  }
   0x4   : > { %p30_p0 = scmp.ge.s32.totalorder %s29_s18, 4  ;;  %p1136_p1 = scmp.ge.s32.totalorder %s1600_s17, 1 }
   0x5   : > { %p340_p2 = scmp.lt.s32.totalorder %s1600_s17, 9 }
   0x6   : > { %s2044_s18 = smov (%p30_p0, %s29_s18), 0  ;;  %s2046_s19 = smov (!%p30_p0, %s32_s19), %s1596_s16 }
   0x7   : > { %p341_p3 = pnand %p1136_p1, %p340_p2  ;;  %p34_p4 = scmp.ge.s32.totalorder %s2046_s19, 2 }
   0x8   : > { %s1137_s20 = sshll.u32 (!%p341_p3), %s1584_s13, 4  ;;  %p386_p5 = scmp.lt.s32.totalorder (!%p341_p3), %s1588_s14, 1 }
   0x9   : > { %s2048_s19 = smov (%p34_p4, %s2046_s19), 0  ;;  %344 = sbr.rel (%p341_p3) target bundleno = 782 (0x30e), region = 60 }
   0xa   : > { %2037 = sst [smem:[#allocation3_spill]] %s2048_s19  ;;  %p388_p6 = scmp.lt.s32.totalorder (!%p341_p3), %s1137_s20, 63 }
   0xb   : > { %p1142_p7 = scmp.ne.s32.totalorder (!%p341_p3), %s1584_s13, 0 }
  0x10   : > { %s2050_s14 = smov (!%p386_p5, %s1588_s14), 1  ;;  %s2052_s20 = smov (!%p388_p6, %s1137_s20), 63 }
  0x11   : > { %s1138_s21 = sshll.u32 %s2050_s14, 6  ;;  %s1140_s22 = sshll.u32 %s2050_s14, 3  ;;  %v1602_v0 = vmov (!%p1142_p7), 0.0  }
  0x12   : > { %s391_s23 = sadd.s32 %s1138_s21, %s2052_s20  ;;  %s1697_s26 = scalar_lea.vmem %s2035_s9, %s1140_s22  ;;  %408 = vst [vmem:[#allocation2] sm:$0xff] (!%p1142_p7), %v1602_v0 }
  0x13   : > { %s1139_s27 = sshll.u32 %s391_s23, 2  ;;  %s1702_s30 = scalar_lea.vmem %s2036_s10, %s1140_s22 }
  0x14   : > { %s393_s19 = scalar_lea.vmem %s2026_s0, %s1139_s27  ;;  %407 = sbr.rel (%p1142_p7) target bundleno = 27 (0x1b), region = 64 }
  0x1b PF: > { %v1488_v1 = vld [vmem:[%s2027_s1] sm:$0xff]   ;;  %v1489_v2 = vld [vmem:[%s2027_s1 + $0x8] sm:$0xff]   ;;  %vm481_vm0 = vcmask 261120   ;;  %v1494_v7 = vld [vmem:[%s393_s19 + $0x10] sm:$0xff]   ;;  %p1179_p8 = scmp.ne.s32.totalorder %s1584_s13, 3 }
  0x1c   : > { %1243 = vmatprep.subr.bf16.mxu0 %v1488_v1  ;;  %1440 = vmatprep.subr.bf16.mxu1 %v1488_v1  ;;  %v1490_v3 = vld [vmem:[%s393_s19] sm:$0xff]   ;;  %v1492_v5 = vld [vmem:[%s393_s19 + $0x8] sm:$0xff]   ;;  %v1495_v8 = vld [vmem:[%s393_s19 + $0x30] sm:$0xff]   ;;  %vm1604_vm1 = vmmov (!%p1179_p8), 0  }
  0x1d   : > { %1244 = vmatpush3.bf16.msra.mxu0 %v1488_v1  ;;  %1442 = vmatpush3.bf16.msra.mxu1 %v1488_v1  ;;  %v1491_v4 = vld [vmem:[%s393_s19 + $0x20] sm:$0xff]   ;;  %v1493_v6 = vld [vmem:[%s393_s19 + $0x28] sm:$0xff]   ;;  %v1496_v9 = vld [vmem:[%s393_s19 + $0x18] sm:$0xff]  }
  0x1e   : > { %1245 = vmatprep.subr.bf16.mxu0 %v1489_v2  ;;  %1441 = vmatprep.subr.bf16.mxu1 %v1489_v2  ;;  %v1497_v10 = vld [vmem:[%s393_s19 + $0x38] sm:$0xff]   ;;  %v1725_v11 = vld [vmem:[%s2028_s2] ss:$0 sm:$0xff] }
  0x1f   : > { %1247 = vmatprep.mubr.msk.bf16.mxu0 %vm481_vm0, %v1490_v3  ;;  %1255 = vmatprep.mubr.msk.bf16.mxu1 %vm481_vm0, %v1491_v4  ;;  %v1730_v13 = vld [vmem:[%s2029_s3] ss:$0 sm:$0xff] }
  0x21   : > { %1246 = vmatpush3.bf16.msra.mxu0 %v1489_v2  ;;  %1443 = vmatpush3.bf16.msra.mxu1 %v1489_v2 }
  0x24   : > { %1248 = vmatmul.mubr.msk.bf16.vlgmr.msra.gmra.mrb[0].mxu0 %vm481_vm0, %v1492_v5  ;;  %1256 = vmatmul.mubr.msk.bf16.vlgmr.msra.gmra.mrb[0].mxu1 %vm481_vm0, %v1493_v6 }
  0x25   : > { %1251 = vmatprep.mubr.msk.bf16.mxu0 %vm481_vm0, %v1494_v7  ;;  %1259 = vmatprep.mubr.msk.bf16.mxu1 %vm481_vm0, %v1495_v8 }
  0x2c   : > { %1252 = vmatmul.mubr.msk.bf16.gmra.mrb[4].mxu0 %vm481_vm0, %v1496_v9  ;;  %1260 = vmatmul.mubr.msk.bf16.gmra.mrb[4].mxu1 %vm481_vm0, %v1497_v10 }
  0xf7   : > { %v1249_v12 = vpop.f32.mrb[0].mxu0  ;;  %v1257_v14 = vpop.f32.mrb[0].mxu1 }
  0xf8   : > { %v610_v15 = vmul.f32 %v1249_v12, %v1725_v11  ;;  %v540_v16 = vpop.f32.mrb[1].mxu0  ;;  %v572_v17 = vpop.f32.mrb[1].mxu1  ;;  %v618_v61 = vmul.f32 %v1257_v14, %v1725_v11 }
  0xf9   : > { %v608_v18 = vmul.f32 %v1725_v11, %v540_v16  ;;  %v1250_v19 = vpop.f32.mrb[2].mxu0  ;;  %v1258_v20 = vpop.f32.mrb[2].mxu1  ;;  %v616_v51 = vmul.f32 %v1725_v11, %v572_v17 }
  0xfa   : > { %v1735_v21 = vadd.f32 %v1730_v13, %v610_v15  ;;  %v611_v22 = vmul.f32 %v1250_v19, %v1725_v11  ;;  %v543_v23 = vpop.f32.mrb[3].mxu0  ;;  %v575_v24 = vpop.f32.mrb[3].mxu1  ;;  %v619_v0 = vmul.f32 %v1258_v20, %v1725_v11  ;;  %v1783_v5 = vadd.f32 %v1730_v13, %v618_v61 }
  0xfb   : > { %v1739_v25 = vadd.f32 %v1730_v13, %v608_v18  ;;  %v609_v26 = vmul.f32 %v1725_v11, %v543_v23  ;;  %v617_v55 = vmul.f32 %v1725_v11, %v575_v24  ;;  %v1769_v59 = vadd.f32 %v1730_v13, %v616_v51 }
  0xfc   : > { %v1165_v27 = vmul.f32 -1.442695, %v1735_v21  ;;  %v1744_v28 = vadd.f32 %v1730_v13, %v611_v22  ;;  %v1788_v8 = vadd.f32 %v1730_v13, %v619_v0  ;;  %v1173_v15 = vmul.f32 -1.442695, %v1783_v5 }
  0xfd   : > { %v1163_v29 = vmul.f32 -1.442695, %v1739_v25  ;;  %v1748_v30 = vadd.f32 %v1730_v13, %v609_v26  ;;  %v1778_v1 = vadd.f32 %v1730_v13, %v617_v55  ;;  %v1171_v4 = vmul.f32 -1.442695, %v1769_v59 }
  0xfe   : > { %v1166_v31 = vmul.f32 -1.442695, %v1744_v28  ;;  %1498 = vpow2.f32 %v1165_v27  ;;  %v1174_v19 = vmul.f32 -1.442695, %v1788_v8 }
  0xff   : > { %v1253_v32 = vpop.f32.mrb[4].mxu0  ;;  %v1261_v33 = vpop.f32.mrb[4].mxu1  ;;  %1500 = vpow2.f32 %v1163_v29  ;;  %v1164_v34 = vmul.f32 -1.442695, %v1748_v30  ;;  %v1172_v9 = vmul.f32 -1.442695, %v1778_v1 }
 0x100   : > { %v556_v35 = vpop.f32.mrb[5].mxu0  ;;  %v588_v36 = vpop.f32.mrb[5].mxu1  ;;  %1502 = vpow2.f32 %v1166_v31  ;;  %v614_v44 = vmul.f32 %v1253_v32, %v1725_v11  ;;  %v622_v12 = vmul.f32 %v1261_v33, %v1725_v11 }
 0x101   : > { %v612_v37 = vmul.f32 %v1725_v11, %v556_v35  ;;  %v1254_v38 = vpop.f32.mrb[6].mxu0  ;;  %v1262_v39 = vpop.f32.mrb[6].mxu1  ;;  %1504 = vpow2.f32 %v1164_v34  ;;  %v620_v6 = vmul.f32 %v1725_v11, %v588_v36 }
 0x102   : > { %v559_v40 = vpop.f32.mrb[7].mxu0  ;;  %v591_v41 = vpop.f32.mrb[7].mxu1  ;;  %v615_v48 = vmul.f32 %v1254_v38, %v1725_v11  ;;  %v1761_v52 = vadd.f32 %v1730_v13, %v614_v44  ;;  %v623_v20 = vmul.f32 %v1262_v39, %v1725_v11  ;;  %v1805_v26 = vadd.f32 %v1730_v13, %v622_v12 }
 0x103   : > { %v1754_v42 = vadd.f32 %v1730_v13, %v612_v37  ;;  %v613_v53 = vmul.f32 %v1725_v11, %v559_v40  ;;  %v621_v10 = vmul.f32 %v1725_v11, %v591_v41  ;;  %v1795_v16 = vadd.f32 %v1730_v13, %v620_v6 }
 0x104   : > { %v1766_v58 = vadd.f32 %v1730_v13, %v615_v48  ;;  %v1169_v60 = vmul.f32 -1.442695, %v1761_v52  ;;  %v1810_v11 = vadd.f32 %v1730_v13, %v623_v20  ;;  %v1177_v36 = vmul.f32 -1.442695, %v1805_v26 }
 0x105   : > { %v1167_v43 = vmul.f32 -1.442695, %v1754_v42  ;;  %v1774_v62 = vadd.f32 %v1730_v13, %v613_v53  ;;  %v1800_v22 = vadd.f32 %v1730_v13, %v621_v10  ;;  %v1175_v29 = vmul.f32 -1.442695, %v1795_v16 }
 0x106   : > { %v1170_v3 = vmul.f32 -1.442695, %v1766_v58 }
 0x107   : > { %1506 = vpow2.f32 %v1167_v43  ;;  %v1168_v7 = vmul.f32 -1.442695, %v1774_v62  ;;  %v1178_v43 = vmul.f32 -1.442695, %v1810_v11 }
 0x108   : > { %v1499_v45 = vpop.eup %1498 }
 0x109   : > { %v1501_v46 = vpop.eup %1500  ;;  %v695_v50 = vadd.f32 1.0, %v1499_v45 }
 0x10a   : > { %v693_v47 = vadd.f32 1.0, %v1501_v46  ;;  %v1503_v49 = vpop.eup %1502 }
 0x10b   : > { %v1505_v54 = vpop.eup %1504  ;;  %v696_v56 = vadd.f32 1.0, %v1503_v49 }
 0x10c   : > { %1508 = vrcp.f32 %v693_v47  ;;  %v694_v57 = vadd.f32 1.0, %v1505_v54 }
 0x10d   : > { %1510 = vrcp.f32 %v695_v50 }
 0x10e   : > { %1512 = vrcp.f32 %v694_v57 }
 0x10f   : > { %1514 = vrcp.f32 %v696_v56 }
 0x110   : > { %1516 = vpow2.f32 %v1169_v60 }
 0x111   : > { %v1507_v63 = vpop.eup %1506 }
 0x112   : > { %v697_v2 = vadd.f32 1.0, %v1507_v63 }
 0x114   : > { %1518 = vrcp.f32 %v697_v2 }
 0x115   : > { %1520 = vpow2.f32 %v1170_v3 }
 0x116   : > { %1522 = vpow2.f32 %v1171_v4  ;;  %v1509_v14 = vpop.eup %1508 }
 0x117   : > { %1524 = vpow2.f32 %v1168_v7  ;;  %v1511_v17 = vpop.eup %1510  ;;  %v741_v23 = vmul.f32 %v1509_v14, %v1739_v25  ;;  %v1176_v25 = vmul.f32 -1.442695, %v1800_v22 }
 0x118   : > { %v1513_v18 = vpop.eup %1512  ;;  %1526 = vpow2.f32 %v1172_v9  ;;  %v743_v32 = vmul.f32 %v1511_v17, %v1735_v21 }
 0x119   : > { %v742_v24 = vmul.f32 %v1513_v18, %v1748_v30  ;;  %v1515_v27 = vpop.eup %1514  ;;  %1528 = vpow2.f32 %v1173_v15 }
 0x11a   : > { %v1517_v31 = vpop.eup %1516  ;;  %1530 = vpow2.f32 %v1174_v19  ;;  %v744_v30 = vmul.f32 %v1515_v27, %v1744_v28 }
 0x11b   : > { %v758_v33 = vadd.f32 %v742_v24, %v741_v23  ;;  %v699_v39 = vadd.f32 1.0, %v1517_v31  ;;  %1532 = vpow2.f32 %v1175_v29 }
 0x11c   : > { %1534 = vpow2.f32 %v1176_v25 }
 0x11d   : > { %v759_v35 = vadd.f32 %v758_v33, %v743_v32  ;;  %1536 = vpow2.f32 %v1177_v36 }
 0x11e   : > { %v1519_v34 = vpop.eup %1518  ;;  %1538 = vrcp.f32 %v699_v39 }
 0x11f   : > { %v745_v37 = vmul.f32 %v1519_v34, %v1754_v42  ;;  %v1521_v38 = vpop.eup %1520  ;;  %v760_v21 = vadd.f32 %v759_v35, %v744_v30 }
 0x120   : > { %v1523_v40 = vpop.eup %1522  ;;  %v700_v44 = vadd.f32 1.0, %v1521_v38 }
 0x121   : > { %v1525_v41 = vpop.eup %1524  ;;  %v761_v13 = vadd.f32 %v760_v21, %v745_v37  ;;  %v701_v28 = vadd.f32 1.0, %v1523_v40  ;;  %v757_v40 = vld [vmem:[#allocation2] sm:$0xff] }
 0x122   : > { %v698_v45 = vadd.f32 1.0, %v1525_v41  ;;  %v1527_v46 = vpop.eup %1526  ;;  %v1603_v41 = vmov (!%p1179_p8), 0.0|0.0  }
 0x123   : > { %v1529_v47 = vpop.eup %1528  ;;  %v702_v42 = vadd.f32 1.0, %v1527_v46  ;;  %1368 = vmatprep.subr.bf16.mxu0 (!%p1179_p8), %v1603_v41  ;;  %1392 = vmatprep.subr.bf16.mxu1 (!%p1179_p8), %v1603_v41  ;;  %v791_v46 = vld [vmem:[%s2030_s4 + $0x20] sm:$0xff] (!%p1179_p8) }
 0x124   : > { %1540 = vrcp.f32 %v698_v45  ;;  %v1531_v48 = vpop.eup %1530  ;;  %v703_v49 = vadd.f32 1.0, %v1529_v47  ;;  %v891_v47 = vld [vmem:[%s2033_s7] sm:$0xff] (!%p1179_p8) }
 0x125   : > { %1542 = vpow2.f32 %v1178_v43  ;;  %v1533_v50 = vpop.eup %1532  ;;  %v704_v51 = vadd.f32 1.0, %v1531_v48 }
 0x126   : > { %1544 = vrcp.f32 %v700_v44  ;;  %v1535_v53 = vpop.eup %1534  ;;  %v705_v55 = vadd.f32 1.0, %v1533_v50  ;;  %v1605_v44 = vmov (!%p1179_p8), 0.0   ;;  %v893_v50 = vld [vmem:[%s2033_s7 + $0x10] sm:$0xff] (!%p1179_p8) }
 0x127   : > { %1546 = vrcp.f32 %v701_v28  ;;  %v1537_v54 = vpop.eup %1536  ;;  %v706_v60 = vadd.f32 1.0, %v1535_v53  ;;  %1295 = vmatprep.mubr.msk.f32.mxu0 (!%p1179_p8), %vm1604_vm1, %v1605_v44  ;;  %1330 = vmatprep.mubr.msk.f32.mxu1 (!%p1179_p8), %vm1604_vm1, %v1605_v44  ;;  %v792_v28 = vld [vmem:[%s2030_s4 + $0x28] sm:$0xff] (!%p1179_p8)  ;;  %v793_v53 = vld [vmem:[%s2030_s4 + $0x30] sm:$0xff] (!%p1179_p8) }
 0x128   : > { %1548 = vrcp.f32 %v702_v42  ;;  %v1539_v56 = vpop.eup %1538  ;;  %v707_v2 = vadd.f32 1.0, %v1537_v54  ;;  %v892_v42 = vld [vmem:[%s2033_s7 + $0x8] sm:$0xff] (!%p1179_p8)  ;;  %v1375_v48 = vpack.c.bf16 (!%p1179_p8), %v792_v28, %v791_v46  ;;  %v794_v54 = vld [vmem:[%s2030_s4 + $0x38] sm:$0xff] (!%p1179_p8) }
 0x129   : > { %1550 = vrcp.f32 %v703_v49  ;;  %v747_v3 = vmul.f32 %v1539_v56, %v1761_v52  ;;  %v1393_v49 = vpack.c.bf16 (!%p1179_p8), %v892_v42, %v891_v47  ;;  %v895_v56 = vld [vmem:[%s2033_s7 + $0x20] sm:$0xff] (!%p1179_p8)  ;;  %v888_v46 = vld [vmem:[%s2032_s6 + $0x68] sm:$0xff] (!%p1179_p8)  ;;  %v889_v47 = vld [vmem:[%s2032_s6 + $0x70] sm:$0xff] (!%p1179_p8) }
 0x12a   : > { %1552 = vrcp.f32 %v704_v51  ;;  %v894_v51 = vld [vmem:[%s2033_s7 + $0x18] sm:$0xff] (!%p1179_p8) }
 0x12b   : > { %1554 = vrcp.f32 %v705_v55  ;;  %1394 = vmatpush3.bf16.msra.mxu1 (!%p1179_p8), %v1393_v49  ;;  %v1396_v55 = vpack.c.bf16 (!%p1179_p8), %v894_v51, %v893_v50  ;;  %v890_v42 = vld [vmem:[%s2032_s6 + $0x78] sm:$0xff] (!%p1179_p8)  ;;  %v874_v49 = vld [vmem:[%s1697_s26] sm:$0xff] (!%p1179_p8) }
 0x12c   : > { %1556 = vrcp.f32 %v706_v60  ;;  %1395 = vmatprep.subr.bf16.mxu1 (!%p1179_p8), %v1603_v41  ;;  %v1378_v60 = vpack.c.bf16 (!%p1179_p8), %v794_v54, %v793_v53  ;;  %v803_v50 = vld [vmem:[%s2031_s5] sm:$0xff] (!%p1179_p8) }
 0x12d   : > { %1558 = vrcp.f32 %v707_v2  ;;  %v897_v2 = vld [vmem:[%s2033_s7 + $0x30] sm:$0xff] (!%p1179_p8) }
 0x12e   : > { %v1541_v57 = vpop.eup %1540 }
 0x12f   : > { %v1543_v61 = vpop.eup %1542  ;;  %v746_v63 = vmul.f32 %v1541_v57, %v1774_v62  ;;  %v896_v57 = vld [vmem:[%s2033_s7 + $0x28] sm:$0xff] (!%p1179_p8)  ;;  %1397 = vmatpush3.bf16.msra.mxu1 (!%p1179_p8), %v1396_v55 }
 0x130   : > { %v1545_v0 = vpop.eup %1544  ;;  %v708_v7 = vadd.f32 1.0, %v1543_v61  ;;  %v795_v61 = vld [vmem:[%s2030_s4 + $0x40] sm:$0xff] (!%p1179_p8)  ;;  %1398 = vmatprep.subr.bf16.mxu1 (!%p1179_p8), %v1603_v41 }
 0x131   : > { %v762_v4 = vadd.f32 %v761_v13, %v746_v63  ;;  %v1547_v6 = vpop.eup %1546  ;;  %v748_v9 = vmul.f32 %v1545_v0, %v1766_v58  ;;  %v790_v13 = vld [vmem:[%s2030_s4 + $0x18] sm:$0xff] (!%p1179_p8)  ;;  %v796_v63 = vld [vmem:[%s2030_s4 + $0x48] sm:$0xff] (!%p1179_p8)  ;;  %v1399_v0 = vpack.c.bf16 (!%p1179_p8), %v896_v57, %v895_v56  ;;  %v1047_v57 = vld [vmem:[%s2034_s8] sm:$0xff] (!%p1179_p8) }
 0x132   : > { %v1549_v12 = vpop.eup %1548  ;;  %v749_v14 = vmul.f32 %v1547_v6, %v1769_v59  ;;  %1560 = vrcp.f32 %v708_v7  ;;  %v797_v6 = vld [vmem:[%s2030_s4 + $0x50] sm:$0xff] (!%p1179_p8)  ;;  %v798_v7 = vld [vmem:[%s2030_s4 + $0x58] sm:$0xff] (!%p1179_p8) }
 0x133   : > { %v763_v10 = vadd.f32 %v762_v4, %v747_v3  ;;  %v1551_v17 = vpop.eup %1550  ;;  %v750_v62 = vmul.f32 %v1549_v12, %v1778_v1  ;;  %v898_v3 = vld [vmem:[%s2033_s7 + $0x38] sm:$0xff] (!%p1179_p8)  ;;  %v1381_v4 = vpack.c.bf16 (!%p1179_p8), %v796_v63, %v795_v61  ;;  %1400 = vmatpush3.bf16.msra.mxu1 (!%p1179_p8), %v1399_v0  ;;  %v900_v12 = vld [vmem:[%s2033_s7 + $0x48] sm:$0xff] (!%p1179_p8) }
 0x134   : > { %v1553_v19 = vpop.eup %1552  ;;  %v751_v52 = vmul.f32 %v1551_v17, %v1783_v5  ;;  %1401 = vmatprep.subr.bf16.mxu1 (!%p1179_p8), %v1603_v41  ;;  %v800_v17 = vld [vmem:[%s2030_s4 + $0x68] sm:$0xff] (!%p1179_p8) }
 0x135   : > { %v764_v15 = vadd.f32 %v763_v10, %v748_v9  ;;  %v1555_v23 = vpop.eup %1554  ;;  %v752_v24 = vmul.f32 %v1553_v19, %v1788_v8  ;;  %v1402_v9 = vpack.c.bf16 (!%p1179_p8), %v898_v3, %v897_v2  ;;  %v899_v10 = vld [vmem:[%s2033_s7 + $0x40] sm:$0xff] (!%p1179_p8)  ;;  %v902_v19 = vld [vmem:[%s2033_s7 + $0x58] sm:$0xff] (!%p1179_p8) }
 0x136   : > { %v1557_v58 = vpop.eup %1556  ;;  %v753_v29 = vmul.f32 %v1555_v23, %v1795_v16  ;;  %v802_v23 = vld [vmem:[%s2030_s4 + $0x78] sm:$0xff] (!%p1179_p8) }
 0x137   : > { %v765_v18 = vadd.f32 %v764_v15, %v749_v14  ;;  %v1559_v32 = vpop.eup %1558  ;;  %v754_v59 = vmul.f32 %v1557_v58, %v1800_v22  ;;  %v787_v22 = vld [vmem:[%s2030_s4] sm:$0xff] (!%p1179_p8)  ;;  %v1384_v14 = vpack.c.bf16 (!%p1179_p8), %v798_v7, %v797_v6  ;;  %1403 = vmatpush3.bf16.msra.mxu1 (!%p1179_p8), %v1402_v9  ;;  %v904_v58 = vld [vmem:[%s2033_s7 + $0x68] sm:$0xff] (!%p1179_p8) }
 0x138   : > { %v755_v1 = vmul.f32 %v1559_v32, %v1805_v26  ;;  %v788_v26 = vld [vmem:[%s2030_s4 + $0x8] sm:$0xff] (!%p1179_p8)  ;;  %v799_v15 = vld [vmem:[%s2030_s4 + $0x60] sm:$0xff] (!%p1179_p8)  ;;  %1404 = vmatprep.subr.bf16.mxu1 (!%p1179_p8), %v1603_v41 }
 0x139   : > { %v766_v20 = vadd.f32 %v765_v18, %v750_v62  ;;  %v1369_v43 = vpack.c.bf16 (!%p1179_p8), %v788_v26, %v787_v22  ;;  %v1405_v62 = vpack.c.bf16 (!%p1179_p8), %v900_v12, %v899_v10  ;;  %v901_v18 = vld [vmem:[%s2033_s7 + $0x50] sm:$0xff] (!%p1179_p8)  ;;  %v875_v32 = vld [vmem:[%s2032_s6] sm:$0xff] (!%p1179_p8)  ;;  %v884_v26 = vld [vmem:[%s2032_s6 + $0x48] sm:$0xff] (!%p1179_p8) }
 0x13a   : > { %v883_v22 = vld [vmem:[%s2032_s6 + $0x40] sm:$0xff] (!%p1179_p8) }
 0x13b   : > { %v767_v27 = vadd.f32 %v766_v20, %v751_v52  ;;  %1370 = vmatpush3.bf16.msra.mxu0 (!%p1179_p8), %v1369_v43  ;;  %v1387_v52 = vpack.c.bf16 (!%p1179_p8), %v800_v17, %v799_v15  ;;  %v801_v20 = vld [vmem:[%s2030_s4 + $0x70] sm:$0xff] (!%p1179_p8)  ;;  %1406 = vmatpush3.bf16.msra.mxu1 (!%p1179_p8), %v1405_v62 }
 0x13c   : > { %v1561_v34 = vpop.eup %1560  ;;  %1371 = vmatprep.subr.bf16.mxu0 (!%p1179_p8), %v1603_v41  ;;  %1407 = vmatprep.subr.bf16.mxu1 (!%p1179_p8), %v1603_v41  ;;  %v885_v43 = vld [vmem:[%s2032_s6 + $0x50] sm:$0xff] (!%p1179_p8) }
 0x13d   : > { %v768_v31 = vadd.f32 %v767_v27, %v752_v24  ;;  %v756_v30 = vmul.f32 %v1561_v34, %v1810_v11  ;;  %v789_v11 = vld [vmem:[%s2030_s4 + $0x10] sm:$0xff] (!%p1179_p8)  ;;  %v1408_v24 = vpack.c.bf16 (!%p1179_p8), %v902_v19, %v901_v18  ;;  %v903_v27 = vld [vmem:[%s2033_s7 + $0x60] sm:$0xff] (!%p1179_p8) }
 0x13e   : > { %v1372_v45 = vpack.c.bf16 (!%p1179_p8), %v790_v13, %v789_v11  ;;  %v1429_v11 = vpack.c.bf16 (!%p1179_p8), %v884_v26, %v883_v22  ;;  %v886_v13 = vld [vmem:[%s2032_s6 + $0x58] sm:$0xff] (!%p1179_p8) }
 0x13f   : > { %v769_v33 = vadd.f32 %v768_v31, %v753_v29  ;;  %v1390_v29 = vpack.c.bf16 (!%p1179_p8), %v802_v23, %v801_v20  ;;  %1409 = vmatpush3.bf16.msra.mxu1 (!%p1179_p8), %v1408_v24 }
 0x140   : > { %1373 = vmatpush3.bf16.msra.mxu0 (!%p1179_p8), %v1372_v45  ;;  %1410 = vmatprep.subr.bf16.mxu1 (!%p1179_p8), %v1603_v41  ;;  %v887_v45 = vld [vmem:[%s2032_s6 + $0x60] sm:$0xff] (!%p1179_p8) }
 0x141   : > { %v770_v25 = vadd.f32 %v769_v33, %v754_v59  ;;  %1374 = vmatprep.subr.bf16.mxu0 (!%p1179_p8), %v1603_v41  ;;  %v876_v59 = vld [vmem:[%s2032_s6 + $0x8] sm:$0xff] (!%p1179_p8)  ;;  %v1411_v33 = vpack.c.bf16 (!%p1179_p8), %v904_v58, %v903_v27  ;;  %v1435_v28 = vpack.c.bf16 (!%p1179_p8), %v888_v46, %v887_v45 }
 0x143   : > { %v771_v5 = vadd.f32 %v770_v25, %v755_v1  ;;  %v905_v1 = vld [vmem:[%s2033_s7 + $0x70] sm:$0xff] (!%p1179_p8)  ;;  %v906_v25 = vld [vmem:[%s2033_s7 + $0x78] sm:$0xff] (!%p1179_p8)  ;;  %1412 = vmatpush3.bf16.msra.mxu1 (!%p1179_p8), %v1411_v33 }
 0x144   : > { %1376 = vmatpush3.bf16.msra.mxu0 (!%p1179_p8), %v1375_v48  ;;  %1413 = vmatprep.subr.bf16.mxu1 (!%p1179_p8), %v1603_v41  ;;  %v1438_v48 = vpack.c.bf16 (!%p1179_p8), %v890_v42, %v889_v47 }
 0x145   : > { %v772_v35 = vadd.f32 %v771_v5, %v756_v30  ;;  %1377 = vmatprep.subr.bf16.mxu0 (!%p1179_p8), %v1603_v41  ;;  %v1417_v30 = vpack.c.bf16 (!%p1179_p8), %v876_v59, %v875_v32  ;;  %v877_v5 = vld [vmem:[%s2032_s6 + $0x10] sm:$0xff] (!%p1179_p8) }
 0x147   : > { %v773_v36 = vrot.slane %v772_v35, 4 }
 0x148   : > { %1379 = vmatpush3.bf16.msra.mxu0 (!%p1179_p8), %v1378_v60 }
 0x149   : > { %v774_v37 = vadd.f32 %v773_v36, %v772_v35  ;;  %1380 = vmatprep.subr.bf16.mxu0 (!%p1179_p8), %v1603_v41  ;;  %v878_v35 = vld [vmem:[%s2032_s6 + $0x18] sm:$0xff] (!%p1179_p8)  ;;  %v1414_v36 = vpack.c.bf16 (!%p1179_p8), %v906_v25, %v905_v1 }
 0x14b   : > { %v775_v8 = vrot.slane %v774_v37, 2  ;;  %1415 = vmatpush3.bf16.msra.mxu1 (!%p1179_p8), %v1414_v36 }
 0x14c   : > { %1382 = vmatpush3.bf16.msra.mxu0 (!%p1179_p8), %v1381_v4 }
 0x14d   : > { %v776_v38 = vadd.f32 %v775_v8, %v774_v37  ;;  %1383 = vmatprep.subr.bf16.mxu0 (!%p1179_p8), %v1603_v41  ;;  %v1420_v37 = vpack.c.bf16 (!%p1179_p8), %v878_v35, %v877_v5  ;;  %v879_v8 = vld [vmem:[%s2032_s6 + $0x20] sm:$0xff] (!%p1179_p8) }
 0x14e   : > { %1331 = vmatmul.mubr.f32.vlgmr.msra.gmra.mrb[0].mxu1 (!%p1179_p8), %v874_v49 }
 0x14f   : > { %v777_v39 = vrot.slane %v776_v38, 1  ;;  %784 = sbr.rel (%p1179_p8) target bundleno = 782 (0x30e), region = 68 }
 0x150   : > { %1385 = vmatpush3.bf16.msra.mxu0 (!%p1179_p8), %v1384_v14 }
 0x151   : > { %v778_v16 = vadd.f32 %v777_v39, %v776_v38  ;;  %1386 = vmatprep.subr.bf16.mxu0 (!%p1179_p8), %v1603_v41  ;;  %v880_v38 = vld [vmem:[%s2032_s6 + $0x28] sm:$0xff] (!%p1179_p8) }
 0x152   : > { %v1423_v39 = vpack.c.bf16 (!%p1179_p8), %v880_v38, %v879_v8 }
 0x153   : > { %v779_v21 = vadd.f32 %v778_v16, %v757_v40  ;;  %v881_v40 = vld [vmem:[%s2032_s6 + $0x30] sm:$0xff] (!%p1179_p8)  ;;  %v882_v16 = vld [vmem:[%s2032_s6 + $0x38] sm:$0xff] (!%p1179_p8) }
 0x154   : > { %1388 = vmatpush3.bf16.msra.mxu0 (!%p1179_p8), %v1387_v52 }
 0x155   : > { %780 = vst [vmem:[#allocation2] sm:$0xff] %v779_v21  ;;  %1389 = vmatprep.subr.bf16.mxu0 (!%p1179_p8), %v1603_v41  ;;  %v1426_v21 = vpack.c.bf16 (!%p1179_p8), %v882_v16, %v881_v40 }
 0x158   : > { %1391 = vmatpush3.bf16.msra.mxu0 %v1390_v29 }
 0x159   : > { %1416 = vmatprep.subr.bf16.mxu0 %v1603_v41 }
 0x15c   : > { %v785_v31 = vld [vmem:[#allocation2] sm:$0xff] }
 0x15d   : > { %v786_v34 = vmul.f32 0.001953125, %v785_v31 }
 0x15f   : > { %1296 = vmatmul.mubr.f32.vlgmr.msra.gmra.mrb[0].mxu0 %v786_v34 }
 0x160   : > { %1418 = vmatpush3.bf16.msra.mxu0 %v1417_v30  ;;  %1365 = vmatprep.mubr.msk.f32.mxu0 %vm1604_vm1, %v1605_v44  ;;  %v1432_v44 = vpack.c.bf16 %v886_v13, %v885_v43 }
 0x161   : > { %1419 = vmatprep.subr.bf16.mxu0 %v1603_v41 }
 0x164   : > { %1421 = vmatpush3.bf16.msra.mxu0 %v1420_v37 }
 0x165   : > { %1422 = vmatprep.subr.bf16.mxu0 %v1603_v41 }
 0x168   : > { %1424 = vmatpush3.bf16.msra.mxu0 %v1423_v39 }
 0x169   : > { %1425 = vmatprep.subr.bf16.mxu0 %v1603_v41 }
 0x16c   : > { %1427 = vmatpush3.bf16.msra.mxu0 %v1426_v21 }
 0x16d   : > { %1428 = vmatprep.subr.bf16.mxu0 %v1603_v41 }
 0x170   : > { %1430 = vmatpush3.bf16.msra.mxu0 %v1429_v11 }
 0x171   : > { %1431 = vmatprep.subr.bf16.mxu0 %v1603_v41 }
 0x174   : > { %1433 = vmatpush3.bf16.msra.mxu0 %v1432_v44 }
 0x175   : > { %1434 = vmatprep.subr.bf16.mxu0 %v1603_v41 }
 0x178   : > { %1436 = vmatpush3.bf16.msra.mxu0 %v1435_v28 }
 0x179   : > { %1437 = vmatprep.subr.bf16.mxu0 %v1603_v41 }
 0x17c   : > { %1439 = vmatpush3.bf16.msra.mxu0 %v1438_v48 }
 0x221   : > { %v973_v54 = vpop.f32.mrb[0].mxu1 }
 0x222   : > { %v1332_v55 = vpop.f32.mrb[1].mxu1 }
 0x232   : > { %v870_v51 = vpop.f32.mrb[0].mxu0 }
 0x233   : > { %v871_v53 = vadd.f32 %v870_v51, %v803_v50  ;;  %v1297_v41 = vpop.f32.mrb[1].mxu0 }
 0x235   : > { %1366 = vmatmul.mubr.f32.vlgmr.msra.gmra.mrb[2].mxu0 %v871_v53 }
 0x308   : > { %v1043_v56 = vpop.f32.mrb[2].mxu0 }
 0x309   : > { %v1044_v60 = vadd.f32 %v1043_v56, %v973_v54  ;;  %v1367_v61 = vpop.f32.mrb[3].mxu0 }
 0x30b   : > { %v1048_v63 = vadd.f32 %v1047_v57, %v1044_v60 }
 0x30d   : > { %1049 = vst [vmem:[%s1702_s30] sm:$0xff] %v1048_v63 }
 0x30e PF: > { %s20_s17 = sadd.s32 1, %s1600_s17   ;;  %s2038_s26 = sld [smem:[#allocation3_spill]] }
 0x30f   : > { %p17_p9 = scmp.ge.s32.totalorder %s20_s17, 10   ;;  %s2039_s13 = smov %s1592_s15 }
 0x310   : > { %s2040_s14 = smov %s1596_s16  ;;  %s2041_s15 = smov %s2044_s18 }
 0x311   :  { %19 = sbr.rel (!%p17_p9) target bundleno = 3 (0x3), region = 101 }
 0x314   : > { %s2042_s16 = smov %s2038_s26 }

</bundles_post_ra>
